<compile_context>
chip_gen: v7x
topology: tpu7x:2x2x1
jax: 0.10.0
libtpu: 0.0.40
codegen_flags: <defaults>
</compile_context>

<pallas_src>
import math
import functools

import jax
import jax.numpy as jnp
from jax.experimental import pallas as pl
from jax.experimental.pallas import tpu as pltpu


def _round_up(x: int, m: int) -> int:
    return (x + m - 1) // m * m


# ----------------------------------------------------------------------------
# Kernel
# ----------------------------------------------------------------------------
def _autoencoder_kernel(
    x_ref, t_ref, table_ref,
    w_x_ref, b_x_ref,
    w_t1_ref, b_t1_ref, w_t2_ref, b_t2_ref,
    w_rin_ref, b_rin_ref, w_rout_ref, b_rout_ref,
    w_o1_ref, b_o1_ref, w_o2_ref, b_o2_ref,
    out_ref,
    *, num_blocks: int,
):
    f32 = jnp.float32
    bf16 = jnp.bfloat16

    # --- fused noise-step embedding lookup: one-hot(t) @ table on the MXU ---
    t_idx = t_ref[...]                                        # (TB, 1) int32
    n_steps_pad = table_ref.shape[0]                          # multiple of 128
    iota = jax.lax.broadcasted_iota(jnp.int32, (t_idx.shape[0], n_steps_pad), 1)
    onehot = (iota == t_idx).astype(bf16)                     # lane-dense operand
    t_emb = jnp.dot(onehot, table_ref[...], preferred_element_type=f32)

    # --- noise-step MLP: Linear -> SiLU -> Linear -> SiLU (SiLU in f32) ---
    t_emb = jnp.dot(t_emb.astype(bf16), w_t1_ref[...],
                    preferred_element_type=f32) + b_t1_ref[...]
    t_emb = t_emb * jax.nn.sigmoid(t_emb)
    t_emb = jnp.dot(t_emb.astype(bf16), w_t2_ref[...],
                    preferred_element_type=f32) + b_t2_ref[...]
    t_emb = t_emb * jax.nn.sigmoid(t_emb)

    # --- input embedding: ReLU(Linear(x)) ---
    x_emb0 = jnp.dot(x_ref[...].astype(bf16), w_x_ref[...],
                     preferred_element_type=f32) + b_x_ref[...]
    x_emb0 = jnp.maximum(x_emb0, 0.0)

    # --- residual blocks (weights shared: ModuleList([block] * num_blocks)) ---
    x_emb = x_emb0
    for _ in range(num_blocks):
        h = x_emb + t_emb
        h = jnp.dot(h.astype(bf16), w_rin_ref[...],
                    preferred_element_type=f32) + b_rin_ref[...]
        h = jnp.maximum(h, 0.0)
        # nn.Dropout(p=0.0) is the identity at inference
        h = jnp.dot(h.astype(bf16), w_rout_ref[...],
                    preferred_element_type=f32) + b_rout_ref[...]
        x_emb = x_emb + h                # block output (x + h)

    # sum of skip connections == x_emb_final - x_emb_initial (exact algebra)
    skip_sum = x_emb - x_emb0

    # --- output head (1/sqrt(num_blocks) is folded into w_o1) ---
    out = jnp.dot(skip_sum.astype(bf16), w_o1_ref[...],
                  preferred_element_type=f32) + b_o1_ref[...]
    out = jnp.maximum(out, 0.0)
    out = jnp.dot(out.astype(bf16), w_o2_ref[...],
                  preferred_element_type=f32) + b_o2_ref[...]

    out_ref[...] = out.astype(out_ref.dtype)


# ----------------------------------------------------------------------------
# Parameters / embedding table (logical, f32, PyTorch-equivalent)
# ----------------------------------------------------------------------------
def build_embedding(num_noise_steps: int, dim: int) -> jnp.ndarray:
    """table[s, :] = [sin(s * f_j), cos(s * f_j)], f_j = 10**(j/(dim-1)*4)."""
    steps = jnp.arange(num_noise_steps, dtype=jnp.float32)[:, None]
    freqs = (10.0 ** (jnp.arange(dim, dtype=jnp.float32) / (dim - 1) * 4.0))[None, :]
    table = steps * freqs
    return jnp.concatenate([jnp.sin(table), jnp.cos(table)], axis=1)


def init_params(key, dim_input: int, dim_emb: int, dim_ff: int):
    """PyTorch-Linear-style uniform init; weights stored (in_features, out_features)."""
    def lin(k, din, dout):
        kw, kb = jax.random.split(k)
        bound = 1.0 / math.sqrt(din)
        w = jax.random.uniform(kw, (din, dout), jnp.float32, -bound, bound)
        b = jax.random.uniform(kb, (1, dout), jnp.float32, -bound, bound)
        return w, b

    keys = jax.random.split(key, 7)
    p = {}
    p["w_x"], p["b_x"] = lin(keys[0], dim_input, dim_emb)      # layer_x
    p["w_t1"], p["b_t1"] = lin(keys[1], dim_emb, dim_emb)      # layer_t_1
    p["w_t2"], p["b_t2"] = lin(keys[2], dim_emb, dim_emb)      # layer_t_2
    p["w_rin"], p["b_rin"] = lin(keys[3], dim_emb, dim_ff)     # residual linear_in
    p["w_rout"], p["b_rout"] = lin(keys[4], dim_ff, dim_emb)   # residual linear_out
    p["w_o1"], p["b_o1"] = lin(keys[5], dim_emb, dim_emb)      # layer_out_1
    p["w_o2"], p["b_o2"] = lin(keys[6], dim_emb, dim_input)    # layer_out_2
    return p


def prepare_kernel_params(params, table, num_blocks: int):
    """One-time padding / casting / scale-folding.  Numerically equivalent:
      * embedding table rows zero-padded to a multiple of 128 (never indexed;
        keeps the one-hot MXU operand lane-dense),
      * dim_ff zero-padded to a multiple of 128 (zero cols/rows -> zero contrib),
      * output lanes of w_o2/b_o2 zero-padded to a multiple of 128 (lane-dense store),
      * 1/sqrt(num_blocks) folded into w_o1 (weight only),
      * matmul operands (weights, table) cast to bf16; biases kept f32.
    """
    bf16 = jnp.bfloat16
    kp = {}

    steps = table.shape[0]
    steps_pad = _round_up(steps, 128)
    kp["table"] = jnp.pad(table, ((0, steps_pad - steps), (0, 0))).astype(bf16)

    kp["w_x"] = params["w_x"].astype(bf16)
    kp["b_x"] = params["b_x"]
    kp["w_t1"] = params["w_t1"].astype(bf16)
    kp["b_t1"] = params["b_t1"]
    kp["w_t2"] = params["w_t2"].astype(bf16)
    kp["b_t2"] = params["b_t2"]

    dim_ff = params["w_rin"].shape[1]
    ff_pad = _round_up(dim_ff, 128)
    kp["w_rin"] = jnp.pad(params["w_rin"], ((0, 0), (0, ff_pad - dim_ff))).astype(bf16)
    kp["b_rin"] = jnp.pad(params["b_rin"], ((0, 0), (0, ff_pad - dim_ff)))
    kp["w_rout"] = jnp.pad(params["w_rout"], ((0, ff_pad - dim_ff), (0, 0))).astype(bf16)
    kp["b_rout"] = params["b_rout"]

    scale = 1.0 / math.sqrt(num_blocks)
    kp["w_o1"] = (params["w_o1"] * scale).astype(bf16)   # fold scale into weight only
    kp["b_o1"] = params["b_o1"]

    dim_input = params["w_o2"].shape[1]
    out_pad = _round_up(dim_input, 128)
    kp["w_o2"] = jnp.pad(params["w_o2"], ((0, 0), (0, out_pad - dim_input))).astype(bf16)
    kp["b_o2"] = jnp.pad(params["b_o2"], ((0, 0), (0, out_pad - dim_input)))
    return kp


# ----------------------------------------------------------------------------
# Wrapper
# ----------------------------------------------------------------------------
def autoencoder_forward(x, t, kparams, num_blocks: int, tile_b: int = 256):
    """x: (B, dim_input) f32; t: (B, 1) int noise steps."""
    B, dim_input = x.shape
    dim_out_pad = kparams["w_o2"].shape[1]

    # Batch tile: multiple of 8 (f32 sublane); activations are tiny (a few
    # (tile_b, 128) f32 slabs) so this stays far under the scoped-VMEM default
    # on every chip while still giving pipelining depth.
    tile_b = min(tile_b, _round_up(B, 8))
    b_pad = _round_up(B, tile_b)

    x_p = jnp.pad(x, ((0, b_pad - B), (0, 0)))
    t_p = jnp.pad(t.astype(jnp.int32).reshape(B, 1), ((0, b_pad - B), (0, 0)))

    weight_args = [
        kparams["table"],
        kparams["w_x"], kparams["b_x"],
        kparams["w_t1"], kparams["b_t1"], kparams["w_t2"], kparams["b_t2"],
        kparams["w_rin"], kparams["b_rin"], kparams["w_rout"], kparams["b_rout"],
        kparams["w_o1"], kparams["b_o1"], kparams["w_o2"], kparams["b_o2"],
    ]

    def resident_spec(arr):
        # Constant block index -> fetched once, stays VMEM-resident across the grid.
        return pl.BlockSpec(arr.shape, lambda i: (0, 0))

    in_specs = [
        pl.BlockSpec((tile_b, dim_input), lambda i: (i, 0)),   # x tile
        pl.BlockSpec((tile_b, 1), lambda i: (i, 0)),           # t tile (int32)
    ] + [resident_spec(a) for a in weight_args]

    out = pl.pallas_call(
        functools.partial(_autoencoder_kernel, num_blocks=num_blocks),
        out_shape=jax.ShapeDtypeStruct((b_pad, dim_out_pad), jnp.float32),
        grid=(b_pad // tile_b,),
        in_specs=in_specs,
        out_specs=pl.BlockSpec((tile_b, dim_out_pad), lambda i: (i, 0)),
        compiler_params=pltpu.CompilerParams(
            dimension_semantics=("parallel",),
        ),
    )(x_p, t_p, *weight_args)

    return out[:B, :dim_input]


# ----------------------------------------------------------------------------
# Pure-JAX f32 reference (matches the PyTorch module)
# ----------------------------------------------------------------------------
def reference_forward(x, t, params, table, num_blocks: int):
    t_emb = jnp.squeeze(table[t], axis=1)
    t_emb = t_emb @ params["w_t1"] + params["b_t1"]
    t_emb = t_emb * jax.nn.sigmoid(t_emb)
    t_emb = t_emb @ params["w_t2"] + params["b_t2"]
    t_emb = t_emb * jax.nn.sigmoid(t_emb)
    x_emb = jnp.maximum(x @ params["w_x"] + params["b_x"], 0.0)
    skips = []
    for _ in range(num_blocks):
        h = jnp.maximum((x_emb + t_emb) @ params["w_rin"] + params["b_rin"], 0.0)
        h = h @ params["w_rout"] + params["b_rout"]
        skips.append(h)
        x_emb = x_emb + h
    out = sum(skips) / math.sqrt(num_blocks)
    out = jnp.maximum(out @ params["w_o1"] + params["b_o1"], 0.0)
    out = out @ params["w_o2"] + params["b_o2"]
    return out


if __name__ == "__main__":
    NUM_NOISE_STEPS = 50
    DIM_INPUT = 16
    DIM_EMB = 128
    DIM_FF = 64
    NUM_BLOCKS = 2
    BATCH = 8

    key = jax.random.PRNGKey(0)
    kx, kt, kp_key = jax.random.split(key, 3)
    x = jax.random.normal(kx, (BATCH, DIM_INPUT), dtype=jnp.float32)
    t = jax.random.randint(kt, (BATCH, 1), 0, NUM_NOISE_STEPS)   # LongTensor noise steps
    params = init_params(kp_key, DIM_INPUT, DIM_EMB, DIM_FF)
    table = build_embedding(NUM_NOISE_STEPS, DIM_EMB // 2)        # (steps, DIM_EMB) f32

    kparams = prepare_kernel_params(params, table, NUM_BLOCKS)

    out = autoencoder_forward(x, t, kparams, NUM_BLOCKS)
    out = jax.block_until_ready(out)

    ref = reference_forward(x, t, params, table, NUM_BLOCKS)
    assert out.shape == (BATCH, DIM_INPUT)
    max_err = float(jnp.max(jnp.abs(out - ref)))
    # bf16 matmul operands with f32 accumulation vs pure-f32 reference.
    assert jnp.allclose(out, ref, atol=5e-2, rtol=5e-2), f"max abs err = {max_err}"
    print("KERNEL_OK")
</pallas_src>

<mosaic_0001>
module attributes {stable_mosaic.version = 11 : i64} {
  func.func @_autoencoder_kernel(%arg0: i32, %arg1: memref<8x16xf32, #tpu.memory_space<vmem>>, %arg2: memref<8x1xi32, #tpu.memory_space<vmem>>, %arg3: memref<128x128xbf16, #tpu.memory_space<vmem>>, %arg4: memref<16x128xbf16, #tpu.memory_space<vmem>>, %arg5: memref<1x128xf32, #tpu.memory_space<vmem>>, %arg6: memref<128x128xbf16, #tpu.memory_space<vmem>>, %arg7: memref<1x128xf32, #tpu.memory_space<vmem>>, %arg8: memref<128x128xbf16, #tpu.memory_space<vmem>>, %arg9: memref<1x128xf32, #tpu.memory_space<vmem>>, %arg10: memref<128x128xbf16, #tpu.memory_space<vmem>>, %arg11: memref<1x128xf32, #tpu.memory_space<vmem>>, %arg12: memref<128x128xbf16, #tpu.memory_space<vmem>>, %arg13: memref<1x128xf32, #tpu.memory_space<vmem>>, %arg14: memref<128x128xbf16, #tpu.memory_space<vmem>>, %arg15: memref<1x128xf32, #tpu.memory_space<vmem>>, %arg16: memref<128x128xbf16, #tpu.memory_space<vmem>>, %arg17: memref<1x128xf32, #tpu.memory_space<vmem>>, %arg18: memref<8x128xf32, #tpu.memory_space<vmem>>) attributes {dimension_semantics = [#tpu.dimension_semantics<parallel>], iteration_bounds = array<i64: 1>, scalar_prefetch = 0 : i64, scratch_operands = 0 : i64, tpu.core_type = #tpu.core_type<tc>, window_params = [{transform_indices = @transform_0, window_bounds = array<i64: 8, 16>}, {transform_indices = @transform_1, window_bounds = array<i64: 8, 1>}, {pipeline_mode = #tpu.pipeline_mode<synchronous>, transform_indices = @transform_2, window_bounds = array<i64: 128, 128>}, {pipeline_mode = #tpu.pipeline_mode<synchronous>, transform_indices = @transform_3, window_bounds = array<i64: 16, 128>}, {pipeline_mode = #tpu.pipeline_mode<synchronous>, transform_indices = @transform_4, window_bounds = array<i64: 1, 128>}, {pipeline_mode = #tpu.pipeline_mode<synchronous>, transform_indices = @transform_5, window_bounds = array<i64: 128, 128>}, {pipeline_mode = #tpu.pipeline_mode<synchronous>, transform_indices = @transform_6, window_bounds = array<i64: 1, 128>}, {pipeline_mode = #tpu.pipeline_mode<synchronous>, transform_indices = @transform_7, window_bounds = array<i64: 128, 128>}, {pipeline_mode = #tpu.pipeline_mode<synchronous>, transform_indices = @transform_8, window_bounds = array<i64: 1, 128>}, {pipeline_mode = #tpu.pipeline_mode<synchronous>, transform_indices = @transform_9, window_bounds = array<i64: 128, 128>}, {pipeline_mode = #tpu.pipeline_mode<synchronous>, transform_indices = @transform_10, window_bounds = array<i64: 1, 128>}, {pipeline_mode = #tpu.pipeline_mode<synchronous>, transform_indices = @transform_11, window_bounds = array<i64: 128, 128>}, {pipeline_mode = #tpu.pipeline_mode<synchronous>, transform_indices = @transform_12, window_bounds = array<i64: 1, 128>}, {pipeline_mode = #tpu.pipeline_mode<synchronous>, transform_indices = @transform_13, window_bounds = array<i64: 128, 128>}, {pipeline_mode = #tpu.pipeline_mode<synchronous>, transform_indices = @transform_14, window_bounds = array<i64: 1, 128>}, {pipeline_mode = #tpu.pipeline_mode<synchronous>, transform_indices = @transform_15, window_bounds = array<i64: 128, 128>}, {pipeline_mode = #tpu.pipeline_mode<synchronous>, transform_indices = @transform_16, window_bounds = array<i64: 1, 128>}, {transform_indices = @transform_17, window_bounds = array<i64: 8, 128>}]} {
    %c0 = arith.constant 0 : index
    %c0_0 = arith.constant 0 : index
    %0 = vector.load %arg2[%c0, %c0_0] : memref<8x1xi32, #tpu.memory_space<vmem>>, vector<8x1xi32>
    %1 = tpu.iota {dimensions = array<i32: 1>} : vector<8x128xi32>
    %2 = vector.broadcast %0 : vector<8x1xi32> to vector<8x128xi32>
    %3 = arith.cmpi eq, %1, %2 : vector<8x128xi32>
    %4 = arith.extui %3 : vector<8x128xi1> to vector<8x128xi32>
    %5 = arith.sitofp %4 : vector<8x128xi32> to vector<8x128xf32>
    %6 = arith.truncf %5 : vector<8x128xf32> to vector<8x128xbf16>
    %c0_1 = arith.constant 0 : index
    %c0_2 = arith.constant 0 : index
    %7 = vector.load %arg3[%c0_1, %c0_2] : memref<128x128xbf16, #tpu.memory_space<vmem>>, vector<128x128xbf16>
    %cst = arith.constant dense<0.000000e+00> : vector<8x128xf32>
    %8 = tpu.matmul %6, %7, %cst {dimension_numbers = #tpu.dot_dimension_numbers<[1], [0], [0], [1], [0, 0, 1, 1], [], []>} : vector<8x128xbf16>, vector<128x128xbf16>, vector<8x128xf32> -> vector<8x128xf32>
    %9 = arith.truncf %8 : vector<8x128xf32> to vector<8x128xbf16>
    %c0_3 = arith.constant 0 : index
    %c0_4 = arith.constant 0 : index
    %10 = vector.load %arg6[%c0_3, %c0_4] : memref<128x128xbf16, #tpu.memory_space<vmem>>, vector<128x128xbf16>
    %cst_5 = arith.constant dense<0.000000e+00> : vector<8x128xf32>
    %11 = tpu.matmul %9, %10, %cst_5 {dimension_numbers = #tpu.dot_dimension_numbers<[1], [0], [0], [1], [0, 0, 1, 1], [], []>} : vector<8x128xbf16>, vector<128x128xbf16>, vector<8x128xf32> -> vector<8x128xf32>
    %c0_6 = arith.constant 0 : index
    %c0_7 = arith.constant 0 : index
    %12 = vector.load %arg7[%c0_6, %c0_7] : memref<1x128xf32, #tpu.memory_space<vmem>>, vector<1x128xf32>
    %13 = vector.broadcast %12 : vector<1x128xf32> to vector<8x128xf32>
    %14 = arith.addf %11, %13 : vector<8x128xf32>
    %15 = arith.negf %14 : vector<8x128xf32>
    %16 = math.exp %15 : vector<8x128xf32>
    %cst_8 = arith.constant 1.000000e+00 : f32
    %17 = vector.broadcast %cst_8 : f32 to vector<8x128xf32>
    %18 = arith.addf %17, %16 : vector<8x128xf32>
    %19 = arith.divf %17, %18 : vector<8x128xf32>
    %20 = arith.mulf %14, %19 : vector<8x128xf32>
    %21 = arith.truncf %20 : vector<8x128xf32> to vector<8x128xbf16>
    %c0_9 = arith.constant 0 : index
    %c0_10 = arith.constant 0 : index
    %22 = vector.load %arg8[%c0_9, %c0_10] : memref<128x128xbf16, #tpu.memory_space<vmem>>, vector<128x128xbf16>
    %cst_11 = arith.constant dense<0.000000e+00> : vector<8x128xf32>
    %23 = tpu.matmul %21, %22, %cst_11 {dimension_numbers = #tpu.dot_dimension_numbers<[1], [0], [0], [1], [0, 0, 1, 1], [], []>} : vector<8x128xbf16>, vector<128x128xbf16>, vector<8x128xf32> -> vector<8x128xf32>
    %c0_12 = arith.constant 0 : index
    %c0_13 = arith.constant 0 : index
    %24 = vector.load %arg9[%c0_12, %c0_13] : memref<1x128xf32, #tpu.memory_space<vmem>>, vector<1x128xf32>
    %25 = vector.broadcast %24 : vector<1x128xf32> to vector<8x128xf32>
    %26 = arith.addf %23, %25 : vector<8x128xf32>
    %27 = arith.negf %26 : vector<8x128xf32>
    %28 = math.exp %27 : vector<8x128xf32>
    %cst_14 = arith.constant 1.000000e+00 : f32
    %29 = vector.broadcast %cst_14 : f32 to vector<8x128xf32>
    %30 = arith.addf %29, %28 : vector<8x128xf32>
    %31 = arith.divf %29, %30 : vector<8x128xf32>
    %32 = arith.mulf %26, %31 : vector<8x128xf32>
    %c0_15 = arith.constant 0 : index
    %c0_16 = arith.constant 0 : index
    %33 = vector.load %arg1[%c0_15, %c0_16] : memref<8x16xf32, #tpu.memory_space<vmem>>, vector<8x16xf32>
    %34 = arith.truncf %33 : vector<8x16xf32> to vector<8x16xbf16>
    %c0_17 = arith.constant 0 : index
    %c0_18 = arith.constant 0 : index
    %35 = vector.load %arg4[%c0_17, %c0_18] : memref<16x128xbf16, #tpu.memory_space<vmem>>, vector<16x128xbf16>
    %cst_19 = arith.constant dense<0.000000e+00> : vector<8x128xf32>
    %36 = tpu.matmul %34, %35, %cst_19 {dimension_numbers = #tpu.dot_dimension_numbers<[1], [0], [0], [1], [0, 0, 1, 1], [], []>} : vector<8x16xbf16>, vector<16x128xbf16>, vector<8x128xf32> -> vector<8x128xf32>
    %c0_20 = arith.constant 0 : index
    %c0_21 = arith.constant 0 : index
    %37 = vector.load %arg5[%c0_20, %c0_21] : memref<1x128xf32, #tpu.memory_space<vmem>>, vector<1x128xf32>
    %38 = vector.broadcast %37 : vector<1x128xf32> to vector<8x128xf32>
    %39 = arith.addf %36, %38 : vector<8x128xf32>
    %cst_22 = arith.constant 0.000000e+00 : f32
    %40 = vector.broadcast %cst_22 : f32 to vector<8x128xf32>
    %41 = arith.maximumf %39, %40 : vector<8x128xf32>
    %42 = arith.addf %41, %32 : vector<8x128xf32>
    %43 = arith.truncf %42 : vector<8x128xf32> to vector<8x128xbf16>
    %c0_23 = arith.constant 0 : index
    %c0_24 = arith.constant 0 : index
    %44 = vector.load %arg10[%c0_23, %c0_24] : memref<128x128xbf16, #tpu.memory_space<vmem>>, vector<128x128xbf16>
    %cst_25 = arith.constant dense<0.000000e+00> : vector<8x128xf32>
    %45 = tpu.matmul %43, %44, %cst_25 {dimension_numbers = #tpu.dot_dimension_numbers<[1], [0], [0], [1], [0, 0, 1, 1], [], []>} : vector<8x128xbf16>, vector<128x128xbf16>, vector<8x128xf32> -> vector<8x128xf32>
    %c0_26 = arith.constant 0 : index
    %c0_27 = arith.constant 0 : index
    %46 = vector.load %arg11[%c0_26, %c0_27] : memref<1x128xf32, #tpu.memory_space<vmem>>, vector<1x128xf32>
    %47 = vector.broadcast %46 : vector<1x128xf32> to vector<8x128xf32>
    %48 = arith.addf %45, %47 : vector<8x128xf32>
    %cst_28 = arith.constant 0.000000e+00 : f32
    %49 = vector.broadcast %cst_28 : f32 to vector<8x128xf32>
    %50 = arith.maximumf %48, %49 : vector<8x128xf32>
    %51 = arith.truncf %50 : vector<8x128xf32> to vector<8x128xbf16>
    %c0_29 = arith.constant 0 : index
    %c0_30 = arith.constant 0 : index
    %52 = vector.load %arg12[%c0_29, %c0_30] : memref<128x128xbf16, #tpu.memory_space<vmem>>, vector<128x128xbf16>
    %cst_31 = arith.constant dense<0.000000e+00> : vector<8x128xf32>
    %53 = tpu.matmul %51, %52, %cst_31 {dimension_numbers = #tpu.dot_dimension_numbers<[1], [0], [0], [1], [0, 0, 1, 1], [], []>} : vector<8x128xbf16>, vector<128x128xbf16>, vector<8x128xf32> -> vector<8x128xf32>
    %c0_32 = arith.constant 0 : index
    %c0_33 = arith.constant 0 : index
    %54 = vector.load %arg13[%c0_32, %c0_33] : memref<1x128xf32, #tpu.memory_space<vmem>>, vector<1x128xf32>
    %55 = vector.broadcast %54 : vector<1x128xf32> to vector<8x128xf32>
    %56 = arith.addf %53, %55 : vector<8x128xf32>
    %57 = arith.addf %41, %56 : vector<8x128xf32>
    %58 = arith.addf %57, %32 : vector<8x128xf32>
    %59 = arith.truncf %58 : vector<8x128xf32> to vector<8x128xbf16>
    %c0_34 = arith.constant 0 : index
    %c0_35 = arith.constant 0 : index
    %60 = vector.load %arg10[%c0_34, %c0_35] : memref<128x128xbf16, #tpu.memory_space<vmem>>, vector<128x128xbf16>
    %cst_36 = arith.constant dense<0.000000e+00> : vector<8x128xf32>
    %61 = tpu.matmul %59, %60, %cst_36 {dimension_numbers = #tpu.dot_dimension_numbers<[1], [0], [0], [1], [0, 0, 1, 1], [], []>} : vector<8x128xbf16>, vector<128x128xbf16>, vector<8x128xf32> -> vector<8x128xf32>
    %c0_37 = arith.constant 0 : index
    %c0_38 = arith.constant 0 : index
    %62 = vector.load %arg11[%c0_37, %c0_38] : memref<1x128xf32, #tpu.memory_space<vmem>>, vector<1x128xf32>
    %63 = vector.broadcast %62 : vector<1x128xf32> to vector<8x128xf32>
    %64 = arith.addf %61, %63 : vector<8x128xf32>
    %cst_39 = arith.constant 0.000000e+00 : f32
    %65 = vector.broadcast %cst_39 : f32 to vector<8x128xf32>
    %66 = arith.maximumf %64, %65 : vector<8x128xf32>
    %67 = arith.truncf %66 : vector<8x128xf32> to vector<8x128xbf16>
    %c0_40 = arith.constant 0 : index
    %c0_41 = arith.constant 0 : index
    %68 = vector.load %arg12[%c0_40, %c0_41] : memref<128x128xbf16, #tpu.memory_space<vmem>>, vector<128x128xbf16>
    %cst_42 = arith.constant dense<0.000000e+00> : vector<8x128xf32>
    %69 = tpu.matmul %67, %68, %cst_42 {dimension_numbers = #tpu.dot_dimension_numbers<[1], [0], [0], [1], [0, 0, 1, 1], [], []>} : vector<8x128xbf16>, vector<128x128xbf16>, vector<8x128xf32> -> vector<8x128xf32>
    %c0_43 = arith.constant 0 : index
    %c0_44 = arith.constant 0 : index
    %70 = vector.load %arg13[%c0_43, %c0_44] : memref<1x128xf32, #tpu.memory_space<vmem>>, vector<1x128xf32>
    %71 = vector.broadcast %70 : vector<1x128xf32> to vector<8x128xf32>
    %72 = arith.addf %69, %71 : vector<8x128xf32>
    %73 = arith.addf %57, %72 : vector<8x128xf32>
    %74 = arith.subf %73, %41 : vector<8x128xf32>
    %75 = arith.truncf %74 : vector<8x128xf32> to vector<8x128xbf16>
    %c0_45 = arith.constant 0 : index
    %c0_46 = arith.constant 0 : index
    %76 = vector.load %arg14[%c0_45, %c0_46] : memref<128x128xbf16, #tpu.memory_space<vmem>>, vector<128x128xbf16>
    %cst_47 = arith.constant dense<0.000000e+00> : vector<8x128xf32>
    %77 = tpu.matmul %75, %76, %cst_47 {dimension_numbers = #tpu.dot_dimension_numbers<[1], [0], [0], [1], [0, 0, 1, 1], [], []>} : vector<8x128xbf16>, vector<128x128xbf16>, vector<8x128xf32> -> vector<8x128xf32>
    %c0_48 = arith.constant 0 : index
    %c0_49 = arith.constant 0 : index
    %78 = vector.load %arg15[%c0_48, %c0_49] : memref<1x128xf32, #tpu.memory_space<vmem>>, vector<1x128xf32>
    %79 = vector.broadcast %78 : vector<1x128xf32> to vector<8x128xf32>
    %80 = arith.addf %77, %79 : vector<8x128xf32>
    %cst_50 = arith.constant 0.000000e+00 : f32
    %81 = vector.broadcast %cst_50 : f32 to vector<8x128xf32>
    %82 = arith.maximumf %80, %81 : vector<8x128xf32>
    %83 = arith.truncf %82 : vector<8x128xf32> to vector<8x128xbf16>
    %c0_51 = arith.constant 0 : index
    %c0_52 = arith.constant 0 : index
    %84 = vector.load %arg16[%c0_51, %c0_52] : memref<128x128xbf16, #tpu.memory_space<vmem>>, vector<128x128xbf16>
    %cst_53 = arith.constant dense<0.000000e+00> : vector<8x128xf32>
    %85 = tpu.matmul %83, %84, %cst_53 {dimension_numbers = #tpu.dot_dimension_numbers<[1], [0], [0], [1], [0, 0, 1, 1], [], []>} : vector<8x128xbf16>, vector<128x128xbf16>, vector<8x128xf32> -> vector<8x128xf32>
    %c0_54 = arith.constant 0 : index
    %c0_55 = arith.constant 0 : index
    %86 = vector.load %arg17[%c0_54, %c0_55] : memref<1x128xf32, #tpu.memory_space<vmem>>, vector<1x128xf32>
    %87 = vector.broadcast %86 : vector<1x128xf32> to vector<8x128xf32>
    %88 = arith.addf %85, %87 : vector<8x128xf32>
    %c0_56 = arith.constant 0 : index
    %c0_57 = arith.constant 0 : index
    %89 = vector.load %arg18[%c0_56, %c0_57] : memref<8x128xf32, #tpu.memory_space<vmem>>, vector<8x128xf32>
    tpu.vector_store %arg18[%c0_56, %c0_57], %88 {strides = array<i32>} : memref<8x128xf32, #tpu.memory_space<vmem>>, vector<8x128xf32>,
    return
  }
  func.func @transform_0(%arg0: i32) -> (i32, i32) {
    %c0_i32 = arith.constant 0 : i32
    %c0_i32_0 = arith.constant 0 : i32
    return %arg0, %c0_i32 : i32, i32
  }
  func.func @transform_1(%arg0: i32) -> (i32, i32) {
    %c0_i32 = arith.constant 0 : i32
    %c0_i32_0 = arith.constant 0 : i32
    return %arg0, %c0_i32 : i32, i32
  }
  func.func @transform_2(%arg0: i32) -> (i32, i32) {
    %c0_i32 = arith.constant 0 : i32
    %c0_i32_0 = arith.constant 0 : i32
    %c0_i32_1 = arith.constant 0 : i32
    return %c0_i32, %c0_i32_0 : i32, i32
  }
  func.func @transform_3(%arg0: i32) -> (i32, i32) {
    %c0_i32 = arith.constant 0 : i32
    %c0_i32_0 = arith.constant 0 : i32
    %c0_i32_1 = arith.constant 0 : i32
    return %c0_i32, %c0_i32_0 : i32, i32
  }
  func.func @transform_4(%arg0: i32) -> (i32, i32) {
    %c0_i32 = arith.constant 0 : i32
    %c0_i32_0 = arith.constant 0 : i32
    %c0_i32_1 = arith.constant 0 : i32
    return %c0_i32, %c0_i32_0 : i32, i32
  }
  func.func @transform_5(%arg0: i32) -> (i32, i32) {
    %c0_i32 = arith.constant 0 : i32
    %c0_i32_0 = arith.constant 0 : i32
    %c0_i32_1 = arith.constant 0 : i32
    return %c0_i32, %c0_i32_0 : i32, i32
  }
  func.func @transform_6(%arg0: i32) -> (i32, i32) {
    %c0_i32 = arith.constant 0 : i32
    %c0_i32_0 = arith.constant 0 : i32
    %c0_i32_1 = arith.constant 0 : i32
    return %c0_i32, %c0_i32_0 : i32, i32
  }
  func.func @transform_7(%arg0: i32) -> (i32, i32) {
    %c0_i32 = arith.constant 0 : i32
    %c0_i32_0 = arith.constant 0 : i32
    %c0_i32_1 = arith.constant 0 : i32
    return %c0_i32, %c0_i32_0 : i32, i32
  }
  func.func @transform_8(%arg0: i32) -> (i32, i32) {
    %c0_i32 = arith.constant 0 : i32
    %c0_i32_0 = arith.constant 0 : i32
    %c0_i32_1 = arith.constant 0 : i32
    return %c0_i32, %c0_i32_0 : i32, i32
  }
  func.func @transform_9(%arg0: i32) -> (i32, i32) {
    %c0_i32 = arith.constant 0 : i32
    %c0_i32_0 = arith.constant 0 : i32
    %c0_i32_1 = arith.constant 0 : i32
    return %c0_i32, %c0_i32_0 : i32, i32
  }
  func.func @transform_10(%arg0: i32) -> (i32, i32) {
    %c0_i32 = arith.constant 0 : i32
    %c0_i32_0 = arith.constant 0 : i32
    %c0_i32_1 = arith.constant 0 : i32
    return %c0_i32, %c0_i32_0 : i32, i32
  }
  func.func @transform_11(%arg0: i32) -> (i32, i32) {
    %c0_i32 = arith.constant 0 : i32
    %c0_i32_0 = arith.constant 0 : i32
    %c0_i32_1 = arith.constant 0 : i32
    return %c0_i32, %c0_i32_0 : i32, i32
  }
  func.func @transform_12(%arg0: i32) -> (i32, i32) {
    %c0_i32 = arith.constant 0 : i32
    %c0_i32_0 = arith.constant 0 : i32
    %c0_i32_1 = arith.constant 0 : i32
    return %c0_i32, %c0_i32_0 : i32, i32
  }
  func.func @transform_13(%arg0: i32) -> (i32, i32) {
    %c0_i32 = arith.constant 0 : i32
    %c0_i32_0 = arith.constant 0 : i32
    %c0_i32_1 = arith.constant 0 : i32
    return %c0_i32, %c0_i32_0 : i32, i32
  }
  func.func @transform_14(%arg0: i32) -> (i32, i32) {
    %c0_i32 = arith.constant 0 : i32
    %c0_i32_0 = arith.constant 0 : i32
    %c0_i32_1 = arith.constant 0 : i32
    return %c0_i32, %c0_i32_0 : i32, i32
  }
  func.func @transform_15(%arg0: i32) -> (i32, i32) {
    %c0_i32 = arith.constant 0 : i32
    %c0_i32_0 = arith.constant 0 : i32
    %c0_i32_1 = arith.constant 0 : i32
    return %c0_i32, %c0_i32_0 : i32, i32
  }
  func.func @transform_16(%arg0: i32) -> (i32, i32) {
    %c0_i32 = arith.constant 0 : i32
    %c0_i32_0 = arith.constant 0 : i32
    %c0_i32_1 = arith.constant 0 : i32
    return %c0_i32, %c0_i32_0 : i32, i32
  }
  func.func @transform_17(%arg0: i32) -> (i32, i32) {
    %c0_i32 = arith.constant 0 : i32
    %c0_i32_0 = arith.constant 0 : i32
    return %arg0, %c0_i32 : i32, i32
  }
}

</mosaic_0001>

<bundles_post_ra>
// kernel: tpu_custom_call.1
= control target key start
LH: loop header
LB: loop body
LE: loop exit
PB: predicated region body
PF: predicated region fallthrough
CT: control target
= control target key end

     0   :  { %s2411_s0 = inlined_call_operand.hbm [shape: f32[8,16], index: 0, kind: input, shape index: {}]   ;;  %s2412_s1 = inlined_call_operand.vmem [shape: s32[8,1], index: 1, kind: input, shape index: {}]   ;;  %s2413_s2 = inlined_call_operand.hbm [shape: bf16[128,128], index: 2, kind: input, shape index: {}]   ;;  %s2414_s3 = inlined_call_operand.hbm [shape: bf16[16,128], index: 3, kind: input, shape index: {}]   ;;  %s2415_s4 = inlined_call_operand.vmem [shape: f32[1,128], index: 4, kind: input, shape index: {}]   ;;  %s2416_s5 = inlined_call_operand.hbm [shape: bf16[128,128], index: 5, kind: input, shape index: {}]   ;;  %s2417_s6 = inlined_call_operand.hbm [shape: f32[1,128], index: 6, kind: input, shape index: {}]   ;;  %s2418_s7 = inlined_call_operand.hbm [shape: bf16[128,128], index: 7, kind: input, shape index: {}]   ;;  %s2419_s8 = inlined_call_operand.hbm [shape: f32[1,128], index: 8, kind: input, shape index: {}]   ;;  %s2420_s9 = inlined_call_operand.hbm [shape: bf16[128,128], index: 9, kind: input, shape index: {}]   ;;  %s2421_s10 = inlined_call_operand.hbm [shape: f32[1,128], index: 10, kind: input, shape index: {}]   ;;  %s2422_s11 = inlined_call_operand.hbm [shape: bf16[128,128], index: 11, kind: input, shape index: {}]   ;;  %s2423_s12 = inlined_call_operand.hbm [shape: f32[1,128], index: 12, kind: input, shape index: {}]   ;;  %s2424_s13 = inlined_call_operand.hbm [shape: bf16[128,128], index: 13, kind: input, shape index: {}]   ;;  %s2425_s14 = inlined_call_operand.hbm [shape: f32[1,128], index: 14, kind: input, shape index: {}]   ;;  %s2426_s15 = inlined_call_operand.vmem [shape: bf16[128,128], index: 15, kind: input, shape index: {}]   ;;  %s2427_s16 = inlined_call_operand.vmem [shape: f32[1,128], index: 16, kind: input, shape index: {}]   ;;  %s2428_s17 = inlined_call_operand.hbm [shape: f32[8,128], index: 17, kind: output, shape index: {}]  }
   0x1   :  { %2431 = sst [smem:[#allocation32_spill]] %s2411_s0 }
   0x2   :  { %2432 = sst [smem:[#allocation33_spill]] %s2412_s1 }
   0x3   :  { %2433 = sst [smem:[#allocation34_spill]] %s2428_s17 }
   0x4   :  { %22 = vsyncpa [#allocation3], 0 }
   0x5   :  { %23 = vsyncpa [#allocation6], 0 }
   0x6   :  { %24 = vsyncpa [#allocation9], 0 }
   0x7   :  { %25 = vsyncpa [#allocation12], 0 }
   0x8   :  { %26 = vsyncpa [#allocation15], 0 }
   0x9   :  { %27 = vsyncpa [#allocation18], 0 }
   0xa   :  { %28 = vsyncpa [#allocation21], 0 }
   0xb   :  { %29 = vsyncpa [#allocation4], 0  ;;  %s1945_s24 = smov [#allocation5]   ;;  %s1621_s28 = scalar_lea.hbm %s2413_s2, 1024 }
   0xc   :  { %s47_s25 = sshll.u32 %s1945_s24, 4  ;;  %p1622_p0 = scmp.ne.s32.totalorder %s2413_s2, %s1621_s28  ;;  %s48_s25 = int_to_ptr.vmem [resolvable:$true] %s47_s25 }
   0xd   :  { %p1625_p1 = scmp.lt.u32.totalorder %s1621_s28, %s2413_s2 }
   0xf   :  { %p1627_p2 = pnand %p1625_p1, %p1622_p0 }
  0x11   :  { %1630 = shalt.err (!%p1627_p2)
}
  0x12   :  { %s1631_s19 = scalar_lea.vmem %s48_s25, 1024  ;;  %p1636_p4 = scmp.lt.s32.totalorder %s48_s25, %s48_s25 }
  0x13   :  { %p1632_p3 = scmp.ne.s32.totalorder %s48_s25, %s1631_s19  ;;  %p1637_p5 = scmp.lt.s32.totalorder %s1631_s19, %s1631_s19 }
  0x15   :  { %p1638_p6 = por %p1637_p5, %p1636_p4 }
  0x17   :  { %p1639_p7 = pnand %p1638_p6, %p1632_p3 }
  0x19   :  { %1642 = shalt.err (!%p1639_p7)
}
  0x1a   :  { %s1946_s1 = smov 64   ;;  %s1947_s20 = smov 4  }
  0x1b   :  { %53 = dma.hbm_to_vmem [thread:$0]  %s2413_s2, 1024, %s48_s25, [#allocation6], %s1946_s1, %s1946_s1, %s1947_s20  }
  0x1c   :  { %s1948_s23 = smov [#allocation8]   ;;  %s1949_s26 = smov [#allocation11]  }
  0x1d   :  { %s73_s24 = sshll.u32 %s1948_s23, 4  ;;  %s95_s27 = sshll.u32 %s1949_s26, 4  ;;  %s74_s24 = int_to_ptr.vmem [resolvable:$true] %s73_s24  ;;  %s96_s27 = int_to_ptr.vmem [resolvable:$true] %s95_s27 }
  0x1e   :  { %s1643_s0 = scalar_lea.hbm %s2416_s5, 1024 }
  0x1f   :  { %p1644_p8 = scmp.ne.s32.totalorder %s2416_s5, %s1643_s0  ;;  %p1647_p9 = scmp.lt.u32.totalorder %s1643_s0, %s2416_s5 }
  0x21   :  { %p1649_p10 = pnand %p1647_p9, %p1644_p8 }
  0x23   :  { %1652 = shalt.err (!%p1649_p10)
}
  0x24   :  { %s1653_s2 = scalar_lea.vmem %s74_s24, 1024  ;;  %p1658_p12 = scmp.lt.s32.totalorder %s74_s24, %s74_s24 }
  0x25   :  { %p1654_p11 = scmp.ne.s32.totalorder %s74_s24, %s1653_s2  ;;  %p1659_p13 = scmp.lt.s32.totalorder %s1653_s2, %s1653_s2 }
  0x27   :  { %p1660_p0 = por %p1659_p13, %p1658_p12 }
  0x29   :  { %p1661_p1 = pnand %p1660_p0, %p1654_p11 }
  0x2b   :  { %1664 = shalt.err (!%p1661_p1)
}
  0x2c   :  { %79 = dma.hbm_to_vmem [thread:$0]  %s2416_s5, 1024, %s74_s24, [#allocation9], %s1946_s1, %s1946_s1, %s1947_s20  }
  0x2d   :  { %s1665_s23 = scalar_lea.hbm %s2418_s7, 1024 }
  0x2e   :  { %p1666_p2 = scmp.ne.s32.totalorder %s2418_s7, %s1665_s23  ;;  %p1669_p3 = scmp.lt.u32.totalorder %s1665_s23, %s2418_s7 }
  0x30   :  { %p1671_p4 = pnand %p1669_p3, %p1666_p2 }
  0x32   :  { %1674 = shalt.err (!%p1671_p4)
}
  0x33   :  { %s1675_s30 = scalar_lea.vmem %s96_s27, 1024  ;;  %p1680_p6 = scmp.lt.s32.totalorder %s96_s27, %s96_s27 }
  0x34   :  { %p1676_p5 = scmp.ne.s32.totalorder %s96_s27, %s1675_s30  ;;  %p1681_p7 = scmp.lt.s32.totalorder %s1675_s30, %s1675_s30 }
  0x36   :  { %p1682_p8 = por %p1681_p7, %p1680_p6 }
  0x38   :  { %p1683_p9 = pnand %p1682_p8, %p1676_p5 }
  0x3a   :  { %1686 = shalt.err (!%p1683_p9)
}
  0x3b   :  { %101 = dma.hbm_to_vmem [thread:$0]  %s2418_s7, 1024, %s96_s27, [#allocation12], %s1946_s1, %s1946_s1, %s1947_s20  }
  0x3c   :  { %s1950_s18 = smov [#allocation14]   ;;  %s1951_s2 = smov [#allocation17]  }
  0x3d   :  { %s117_s19 = sshll.u32 %s1950_s18, 4  ;;  %s139_s25 = sshll.u32 %s1951_s2, 4  ;;  %s118_s19 = int_to_ptr.vmem [resolvable:$true] %s117_s19  ;;  %s140_s25 = int_to_ptr.vmem [resolvable:$true] %s139_s25 }
  0x3e   :  { %s1687_s17 = scalar_lea.hbm %s2420_s9, 1024 }
  0x3f   :  { %p1688_p10 = scmp.ne.s32.totalorder %s2420_s9, %s1687_s17  ;;  %p1691_p11 = scmp.lt.u32.totalorder %s1687_s17, %s2420_s9 }
  0x41   :  { %p1693_p12 = pnand %p1691_p11, %p1688_p10 }
  0x43   :  { %1696 = shalt.err (!%p1693_p12)
}
  0x44   :  { %s1697_s7 = scalar_lea.vmem %s118_s19, 1024  ;;  %p1702_p0 = scmp.lt.s32.totalorder %s118_s19, %s118_s19 }
  0x45   :  { %p1698_p13 = scmp.ne.s32.totalorder %s118_s19, %s1697_s7  ;;  %p1703_p1 = scmp.lt.s32.totalorder %s1697_s7, %s1697_s7 }
  0x47   :  { %p1704_p2 = por %p1703_p1, %p1702_p0 }
  0x49   :  { %p1705_p3 = pnand %p1704_p2, %p1698_p13 }
  0x4b   :  { %1708 = shalt.err (!%p1705_p3)
}
  0x4c   :  { %123 = dma.hbm_to_vmem [thread:$0]  %s2420_s9, 1024, %s118_s19, [#allocation15], %s1946_s1, %s1946_s1, %s1947_s20  }
  0x4d   :  { %s1709_s24 = scalar_lea.hbm %s2422_s11, 1024 }
  0x4e   :  { %p1710_p4 = scmp.ne.s32.totalorder %s2422_s11, %s1709_s24  ;;  %p1713_p5 = scmp.lt.u32.totalorder %s1709_s24, %s2422_s11 }
  0x50   :  { %p1715_p6 = pnand %p1713_p5, %p1710_p4 }
  0x52   :  { %1718 = shalt.err (!%p1715_p6)
}
  0x53   :  { %s1719_s17 = scalar_lea.vmem %s140_s25, 1024  ;;  %p1724_p8 = scmp.lt.s32.totalorder %s140_s25, %s140_s25 }
  0x54   :  { %p1720_p7 = scmp.ne.s32.totalorder %s140_s25, %s1719_s17  ;;  %p1725_p9 = scmp.lt.s32.totalorder %s1719_s17, %s1719_s17 }
  0x56   :  { %p1726_p10 = por %p1725_p9, %p1724_p8 }
  0x58   :  { %p1727_p11 = pnand %p1726_p10, %p1720_p7 }
  0x5a   :  { %1730 = shalt.err (!%p1727_p11)
}
  0x5b   :  { %145 = dma.hbm_to_vmem [thread:$0]  %s2422_s11, 1024, %s140_s25, [#allocation18], %s1946_s1, %s1946_s1, %s1947_s20  }
  0x5c   :  { %s1952_s23 = smov [#allocation20]   ;;  %s1953_s28 = smov [#allocation2]  }
  0x5d   :  { %s161_s26 = sshll.u32 %s1952_s23, 4  ;;  %s36_s29 = sshll.u32 %s1953_s28, 4  ;;  %s162_s26 = int_to_ptr.vmem [resolvable:$true] %s161_s26  ;;  %s37_s29 = int_to_ptr.vmem [resolvable:$true] %s36_s29 }
  0x5e   :  { %s1731_s0 = scalar_lea.hbm %s2424_s13, 1024 }
  0x5f   :  { %p1732_p12 = scmp.ne.s32.totalorder %s2424_s13, %s1731_s0  ;;  %p1735_p13 = scmp.lt.u32.totalorder %s1731_s0, %s2424_s13 }
  0x61   :  { %p1737_p0 = pnand %p1735_p13, %p1732_p12 }
  0x63   :  { %1740 = shalt.err (!%p1737_p0)
}
  0x64   :  { %s1741_s11 = scalar_lea.vmem %s162_s26, 1024  ;;  %p1746_p2 = scmp.lt.s32.totalorder %s162_s26, %s162_s26 }
  0x65   :  { %p1742_p1 = scmp.ne.s32.totalorder %s162_s26, %s1741_s11  ;;  %p1747_p3 = scmp.lt.s32.totalorder %s1741_s11, %s1741_s11 }
  0x67   :  { %p1748_p4 = por %p1747_p3, %p1746_p2 }
  0x69   :  { %p1749_p5 = pnand %p1748_p4, %p1742_p1 }
  0x6b   :  { %1752 = shalt.err (!%p1749_p5)
}
  0x6c   :  { %167 = dma.hbm_to_vmem [thread:$0]  %s2424_s13, 1024, %s162_s26, [#allocation21], %s1946_s1, %s1946_s1, %s1947_s20  }
  0x6d   :  { %s2434_s17 = sld [smem:[#allocation32_spill]] }
  0x73   :  { %s1753_s9 = scalar_lea.hbm %s2434_s17, 128 }
  0x74   :  { %p1754_p6 = scmp.ne.s32.totalorder %s2434_s17, %s1753_s9  ;;  %p1757_p7 = scmp.lt.u32.totalorder %s1753_s9, %s2434_s17 }
  0x76   :  { %p1759_p8 = pnand %p1757_p7, %p1754_p6 }
  0x78   :  { %1762 = shalt.err (!%p1759_p8)
}
  0x79   :  { %s1763_s27 = scalar_lea.vmem %s37_s29, 128  ;;  %p1768_p10 = scmp.lt.s32.totalorder %s37_s29, %s37_s29 }
  0x7a   :  { %p1764_p9 = scmp.ne.s32.totalorder %s37_s29, %s1763_s27  ;;  %p1769_p11 = scmp.lt.s32.totalorder %s1763_s27, %s1763_s27 }
  0x7c   :  { %p1770_p12 = por %p1769_p11, %p1768_p10 }
  0x7e   :  { %p1771_p13 = pnand %p1770_p12, %p1764_p9 }
  0x80   :  { %1774 = shalt.err (!%p1771_p13)
}
  0x81   :  { %39 = dma.hbm_to_vmem [thread:$0]  %s2434_s17, 128, %s37_s29, [#allocation3]  }
  0x82   :  { %s1954_s0 = smov [#allocation7]   ;;  %s1955_s5 = smov [#allocation10]  }
  0x83   :  { %s59_s30 = sshll.u32 %s1954_s0, 4  ;;  %s86_s24 = sshll.u32 %s1955_s5, 4  ;;  %s60_s30 = int_to_ptr.vmem [resolvable:$true] %s59_s30  ;;  %s87_s24 = int_to_ptr.vmem [resolvable:$true] %s86_s24 }
  0x84   :  { %s1775_s25 = scalar_lea.hbm %s2414_s3, 128 }
  0x85   :  { %p1776_p0 = scmp.ne.s32.totalorder %s2414_s3, %s1775_s25  ;;  %p1779_p1 = scmp.lt.u32.totalorder %s1775_s25, %s2414_s3 }
  0x87   :  { %p1781_p2 = pnand %p1779_p1, %p1776_p0 }
  0x89   :  { %1784 = shalt.err (!%p1781_p2)
}
  0x8a   :  { %s1785_s29 = scalar_lea.vmem %s60_s30, 128  ;;  %p1790_p4 = scmp.lt.s32.totalorder %s60_s30, %s60_s30 }
  0x8b   :  { %p1786_p3 = scmp.ne.s32.totalorder %s60_s30, %s1785_s29  ;;  %p1791_p5 = scmp.lt.s32.totalorder %s1785_s29, %s1785_s29 }
  0x8d   :  { %p1792_p6 = por %p1791_p5, %p1790_p4 }
  0x8f   :  { %p1793_p7 = pnand %p1792_p6, %p1786_p3 }
  0x91   :  { %1796 = shalt.err (!%p1793_p7)
}
  0x92   :  { %65 = dma.hbm_to_vmem [thread:$0]  %s2414_s3, 128, %s60_s30, [#allocation6], %s1946_s1, %s1946_s1, %s1947_s20  }
  0x93   :  { %s1797_s7 = scalar_lea.hbm %s2417_s6, 16 }
  0x94   :  { %p1798_p8 = scmp.ne.s32.totalorder %s2417_s6, %s1797_s7  ;;  %p1801_p9 = scmp.lt.u32.totalorder %s1797_s7, %s2417_s6 }
  0x96   :  { %p1803_p10 = pnand %p1801_p9, %p1798_p8 }
  0x98   :  { %1806 = shalt.err (!%p1803_p10)
}
  0x99   :  { %s1807_s5 = scalar_lea.vmem %s87_s24, 16  ;;  %s1811_s18 = scalar_lea.vmem %s87_s24, 32 }
  0x9a   :  { %p1808_p11 = scmp.ne.s32.totalorder %s87_s24, %s1807_s5  ;;  %p1812_p12 = scmp.lt.s32.totalorder %s87_s24, %s87_s24 }
  0x9b   :  { %p1813_p13 = scmp.lt.s32.totalorder %s1811_s18, %s1807_s5 }
  0x9d   :  { %p1814_p0 = por %p1813_p13, %p1812_p12 }
  0x9f   :  { %p1815_p1 = pnand %p1814_p0, %p1808_p11 }
  0xa1   :  { %1818 = shalt.err (!%p1815_p1)
}
  0xa2   :  { %89 = dma.hbm_to_vmem [thread:$0]  %s2417_s6, 16, %s87_s24, [#allocation9]  }
  0xa3   :  { %s1956_s20 = smov [#allocation13]   ;;  %s1957_s11 = smov [#allocation16]  }
  0xa4   :  { %s108_s30 = sshll.u32 %s1956_s20, 4  ;;  %s130_s25 = sshll.u32 %s1957_s11, 4  ;;  %s109_s30 = int_to_ptr.vmem [resolvable:$true] %s108_s30  ;;  %s131_s25 = int_to_ptr.vmem [resolvable:$true] %s130_s25 }
  0xa5   :  { %s1819_s22 = scalar_lea.hbm %s2419_s8, 16 }
  0xa6   :  { %p1820_p2 = scmp.ne.s32.totalorder %s2419_s8, %s1819_s22  ;;  %p1823_p3 = scmp.lt.u32.totalorder %s1819_s22, %s2419_s8 }
  0xa8   :  { %p1825_p4 = pnand %p1823_p3, %p1820_p2 }
  0xaa   :  { %1828 = shalt.err (!%p1825_p4)
}
  0xab   :  { %s1829_s6 = scalar_lea.vmem %s109_s30, 16  ;;  %s1833_s24 = scalar_lea.vmem %s109_s30, 32 }
  0xac   :  { %p1830_p5 = scmp.ne.s32.totalorder %s109_s30, %s1829_s6  ;;  %p1834_p6 = scmp.lt.s32.totalorder %s109_s30, %s109_s30 }
  0xad   :  { %p1835_p7 = scmp.lt.s32.totalorder %s1833_s24, %s1829_s6 }
  0xaf   :  { %p1836_p8 = por %p1835_p7, %p1834_p6 }
  0xb1   :  { %p1837_p9 = pnand %p1836_p8, %p1830_p5 }
  0xb3   :  { %1840 = shalt.err (!%p1837_p9)
}
  0xb4   :  { %111 = dma.hbm_to_vmem [thread:$0]  %s2419_s8, 16, %s109_s30, [#allocation12]  }
  0xb5   :  { %s1841_s13 = scalar_lea.hbm %s2421_s10, 16 }
  0xb6   :  { %p1842_p10 = scmp.ne.s32.totalorder %s2421_s10, %s1841_s13  ;;  %p1845_p11 = scmp.lt.u32.totalorder %s1841_s13, %s2421_s10 }
  0xb8   :  { %p1847_p12 = pnand %p1845_p11, %p1842_p10 }
  0xba   :  { %1850 = shalt.err (!%p1847_p12)
}
  0xbb   :  { %s1851_s3 = scalar_lea.vmem %s131_s25, 16  ;;  %s1855_s1 = scalar_lea.vmem %s131_s25, 32 }
  0xbc   :  { %p1852_p13 = scmp.ne.s32.totalorder %s131_s25, %s1851_s3  ;;  %p1856_p0 = scmp.lt.s32.totalorder %s131_s25, %s131_s25 }
  0xbd   :  { %p1857_p1 = scmp.lt.s32.totalorder %s1855_s1, %s1851_s3 }
  0xbf   :  { %p1858_p2 = por %p1857_p1, %p1856_p0 }
  0xc1   :  { %p1859_p3 = pnand %p1858_p2, %p1852_p13 }
  0xc3   :  { %1862 = shalt.err (!%p1859_p3)
}
  0xc4   :  { %133 = dma.hbm_to_vmem [thread:$0]  %s2421_s10, 16, %s131_s25, [#allocation15]  }
  0xc5   :  { %s1958_s30 = smov [#allocation19]   ;;  %s1959_s2 = smov [#allocation22]  }
  0xc6   :  { %s152_s11 = sshll.u32 %s1958_s30, 4  ;;  %s174_s21 = sshll.u32 %s1959_s2, 4  ;;  %s153_s11 = int_to_ptr.vmem [resolvable:$true] %s152_s11  ;;  %s175_s21 = int_to_ptr.vmem [resolvable:$true] %s174_s21 }
  0xc7   :  { %s1863_s29 = scalar_lea.hbm %s2423_s12, 16 }
  0xc8   :  { %p1864_p4 = scmp.ne.s32.totalorder %s2423_s12, %s1863_s29  ;;  %p1867_p5 = scmp.lt.u32.totalorder %s1863_s29, %s2423_s12 }
  0xca   :  { %p1869_p6 = pnand %p1867_p5, %p1864_p4 }
  0xcc   :  { %1872 = shalt.err (!%p1869_p6)
}
  0xcd   :  { %s1873_s10 = scalar_lea.vmem %s153_s11, 16  ;;  %s1877_s25 = scalar_lea.vmem %s153_s11, 32 }
  0xce   :  { %p1874_p7 = scmp.ne.s32.totalorder %s153_s11, %s1873_s10  ;;  %p1878_p8 = scmp.lt.s32.totalorder %s153_s11, %s153_s11 }
  0xcf   :  { %p1879_p9 = scmp.lt.s32.totalorder %s1877_s25, %s1873_s10 }
  0xd1   :  { %p1880_p10 = por %p1879_p9, %p1878_p8 }
  0xd3   :  { %p1881_p11 = pnand %p1880_p10, %p1874_p7 }
  0xd5   :  { %1884 = shalt.err (!%p1881_p11)
}
  0xd6   :  { %155 = dma.hbm_to_vmem [thread:$0]  %s2423_s12, 16, %s153_s11, [#allocation18]  }
  0xd7   :  { %s1885_s13 = scalar_lea.hbm %s2425_s14, 16 }
  0xd8   :  { %p1886_p12 = scmp.ne.s32.totalorder %s2425_s14, %s1885_s13  ;;  %p1889_p13 = scmp.lt.u32.totalorder %s1885_s13, %s2425_s14 }
  0xda   :  { %p1891_p0 = pnand %p1889_p13, %p1886_p12 }
  0xdc   :  { %1894 = shalt.err (!%p1891_p0)
}
  0xdd   :  { %s1895_s3 = scalar_lea.vmem %s175_s21, 16  ;;  %s1899_s1 = scalar_lea.vmem %s175_s21, 32 }
  0xde   :  { %p1896_p1 = scmp.ne.s32.totalorder %s175_s21, %s1895_s3  ;;  %p1900_p2 = scmp.lt.s32.totalorder %s175_s21, %s175_s21 }
  0xdf   :  { %p1901_p3 = scmp.lt.s32.totalorder %s1899_s1, %s1895_s3 }
  0xe1   :  { %p1902_p4 = por %p1901_p3, %p1900_p2 }
  0xe3   :  { %p1903_p5 = pnand %p1902_p4, %p1896_p1 }
  0xe5   :  { %1906 = shalt.err (!%p1903_p5)
}
  0xe6   :  { %177 = dma.hbm_to_vmem [thread:$0]  %s2425_s14, 16, %s175_s21, [#allocation21]  }
  0xe7   :  { %1929 = dma.done.wait [#allocation3], 128  }
  0xe8   :  { %1930 = vsyncadd [#allocation3], 4294967168 }
  0xe9   :  { %1931 = dma.done.wait [#allocation6], 1152  }
  0xea   :  { %1932 = vsyncadd [#allocation6], 4294966144 }
  0xeb   :  { %1933 = dma.done.wait [#allocation9], 1040  }
  0xec   :  { %1934 = vsyncadd [#allocation9], 4294966256 }
  0xed   :  { %1935 = dma.done.wait [#allocation12], 1040  }
  0xee   :  { %1936 = vsyncadd [#allocation12], 4294966256 }
  0xef   :  { %1937 = dma.done.wait [#allocation15], 1040  }
  0xf0   :  { %1938 = vsyncadd [#allocation15], 4294966256 }
  0xf1   :  { %1939 = dma.done.wait [#allocation18], 1040  }
  0xf2   :  { %1940 = vsyncadd [#allocation18], 4294966256 }
  0xf3   :  { %1941 = dma.done.wait [#allocation21], 1040  }
  0xf4   :  { %1942 = vsyncadd [#allocation21], 4294966256  ;;  %v1960_v0 = vmov 0   ;;  %v1961_v1 = vmov 0.0   ;;  %s2435_s30 = sld [smem:[#allocation33_spill]]  ;;  %v1556_v3 = vld [vmem:[#allocation5] sm:$0xff]   ;;  %v223_v18 = vlaneseq }
  0xf5   :  { %1555 = vset.pattern.permute.xlu0 %v1960_v0  ;;  %1349 = vmatprep.subr.bf16.mxu0 %v1961_v1  ;;  %vm1962_vm0 = vmmov 0   ;;  %v1557_v4 = vld [vmem:[#allocation5 + $0x8] sm:$0xff]   ;;  %v1558_v5 = vld [vmem:[#allocation5 + $0x10] sm:$0xff]   ;;  %v1559_v8 = vld [vmem:[#allocation5 + $0x18] sm:$0xff]   ;;  %v1963_v21 = vmov 1.0|1.0  }
  0xf6   :  { %1369 = vmatprep.subr.bf16.mxu1 %v1961_v1  ;;  %1365 = vmatprep.mubr.msk.bf16.mxu0 %vm1962_vm0, %v1961_v1  ;;  %v1564_v6 = vld [vmem:[#allocation8] sm:$0xff]   ;;  %v1565_v7 = vld [vmem:[#allocation8 + $0x8] sm:$0xff]   ;;  %v1566_v9 = vld [vmem:[#allocation8 + $0x10] sm:$0xff]   ;;  %v224_v19 = vand.u32 127, %v223_v18  ;;  %vm591_vm3 = vcmask 130048   ;;  %s1964_s5 = smov [#allocation23]  }
  0xf7   :  { %1385 = vmatprep.mubr.msk.bf16.mxu1 %vm1962_vm0, %v1961_v1  ;;  %1350 = vmatpush3.bf16.msra.mxu0 %v1556_v3  ;;  %v1560_v10 = vld [vmem:[#allocation5 + $0x20] sm:$0xff]   ;;  %v1561_v12 = vld [vmem:[#allocation5 + $0x28] sm:$0xff]   ;;  %v1562_v14 = vld [vmem:[#allocation5 + $0x30] sm:$0xff]   ;;  %s1181_s18 = sshll.u32 %s1964_s5, 4  ;;  %s1182_s18 = int_to_ptr.vmem [resolvable:$true] %s1181_s18 }
  0xf8   :  { %1351 = vmatprep.subr.bf16.mxu0 %v1961_v1  ;;  %1370 = vmatpush3.bf16.msra.mxu1 %v1564_v6  ;;  %v1567_v11 = vld [vmem:[#allocation8 + $0x18] sm:$0xff]   ;;  %v1568_v13 = vld [vmem:[#allocation8 + $0x20] sm:$0xff]   ;;  %v1569_v15 = vld [vmem:[#allocation8 + $0x28] sm:$0xff]   ;;  %p1912_p7 = scmp.lt.s32.totalorder %s1182_s18, %s1182_s18 }
  0xf9   :  { %1371 = vmatprep.subr.bf16.mxu1 %v1961_v1  ;;  %v1563_v16 = vld [vmem:[#allocation5 + $0x38] sm:$0xff]   ;;  %v1571_v22 = vld [vmem:[#allocation8 + $0x38] sm:$0xff]   ;;  %v1572_v28 = vld [vmem:[#allocation11] sm:$0xff]  }
  0xfa   :  { %v222_v2 = vld [vmem:[%s2435_s30] sm:$0xff]  ;;  %v1575_v31 = vld [vmem:[#allocation11 + $0x18] sm:$0xff]   ;;  %v1576_v32 = vld [vmem:[#allocation11 + $0x20] sm:$0xff]  }
  0xfb   :  { %226 = vperm.xlu0 %1555, %v222_v2   ;;  %1352 = vmatpush3.bf16.msra.mxu0 %v1557_v4  ;;  %v1570_v17 = vld [vmem:[#allocation8 + $0x30] sm:$0xff]   ;;  %v1579_v35 = vld [vmem:[#allocation11 + $0x38] sm:$0xff]   ;;  %v2274_v51 = vld [vmem:[#allocation14] sm:$0xff]  }
  0xfc   :  { %1353 = vmatprep.subr.bf16.mxu0 %v1961_v1  ;;  %1372 = vmatpush3.bf16.msra.mxu1 %v1565_v7  ;;  %v1573_v29 = vld [vmem:[#allocation11 + $0x8] sm:$0xff]   ;;  %v1574_v30 = vld [vmem:[#allocation11 + $0x10] sm:$0xff]   ;;  %v1207_v39 = vld [vmem:[#allocation10] ss:$0 sm:$0xff] }
  0xfd   :  { %1373 = vmatprep.subr.bf16.mxu1 %v1961_v1  ;;  %v1577_v33 = vld [vmem:[#allocation11 + $0x28] sm:$0xff]   ;;  %v1578_v34 = vld [vmem:[#allocation11 + $0x30] sm:$0xff]   ;;  %v1584_v54 = vld [vmem:[#allocation14 + $0x18] sm:$0xff]  }
  0xfe   :  { %v1580_v36 = vld [vmem:[#allocation7] sm:$0xff]   ;;  %v574_v37 = vld [vmem:[#allocation2] sm:$0xff]  ;;  %v1585_v55 = vld [vmem:[#allocation14 + $0x20] sm:$0xff]  }
  0xff   :  { %1354 = vmatpush3.bf16.msra.mxu0 %v1558_v5  ;;  %v575_v38 = vpack.c.bf16 %v574_v37, %v574_v37  ;;  %v2278_v52 = vld [vmem:[#allocation14 + $0x8] sm:$0xff]   ;;  %v2282_v53 = vld [vmem:[#allocation14 + $0x10] sm:$0xff]   ;;  %v1588_v62 = vld [vmem:[#allocation14 + $0x38] sm:$0xff]  }
 0x100   :  { %1355 = vmatprep.subr.bf16.mxu0 %v1961_v1  ;;  %1374 = vmatpush3.bf16.msra.mxu1 %v1566_v9  ;;  %v1586_v56 = vld [vmem:[#allocation14 + $0x28] sm:$0xff]   ;;  %v1587_v61 = vld [vmem:[#allocation14 + $0x30] sm:$0xff]   ;;  %v2302_v3 = vld [vmem:[#allocation17 + $0x18] sm:$0xff]  }
 0x101   :  { %1375 = vmatprep.subr.bf16.mxu1 %v1961_v1  ;;  %v2291_v63 = vld [vmem:[#allocation17] sm:$0xff]   ;;  %v2294_v0 = vld [vmem:[#allocation17 + $0x8] sm:$0xff]   ;;  %v2298_v2 = vld [vmem:[#allocation17 + $0x10] sm:$0xff]  }
 0x102   :  { %v2306_v4 = vld [vmem:[#allocation17 + $0x20] sm:$0xff]   ;;  %v2310_v5 = vld [vmem:[#allocation17 + $0x28] sm:$0xff]   ;;  %v1217_v6 = vld [vmem:[#allocation13] ss:$0 sm:$0xff] }
 0x103   :  { %1356 = vmatpush3.bf16.msra.mxu0 %v1559_v8 }
 0x104   :  { %1357 = vmatprep.subr.bf16.mxu0 %v1961_v1  ;;  %1376 = vmatpush3.bf16.msra.mxu1 %v1567_v11 }
 0x105   :  { %1377 = vmatprep.subr.bf16.mxu1 %v1961_v1 }
 0x107   :  { %1358 = vmatpush3.bf16.msra.mxu0 %v1560_v10 }
 0x108   :  { %1359 = vmatprep.subr.bf16.mxu0 %v1961_v1  ;;  %1378 = vmatpush3.bf16.msra.mxu1 %v1568_v13 }
 0x109   :  { %1379 = vmatprep.subr.bf16.mxu1 %v1961_v1 }
 0x10b   :  { %1360 = vmatpush3.bf16.msra.mxu0 %v1561_v12 }
 0x10c   :  { %1361 = vmatprep.subr.bf16.mxu0 %v1961_v1  ;;  %1380 = vmatpush3.bf16.msra.mxu1 %v1569_v15  ;;  %v1227_v15 = vld [vmem:[%s2415_s4] ss:$0 sm:$0xff] }
 0x10d   :  { %1381 = vmatprep.subr.bf16.mxu1 %v1961_v1 }
 0x10f   :  { %1362 = vmatpush3.bf16.msra.mxu0 %v1562_v14 }
 0x110   :  { %1363 = vmatprep.subr.bf16.mxu0 %v1961_v1  ;;  %1382 = vmatpush3.bf16.msra.mxu1 %v1570_v17 }
 0x111   :  { %1383 = vmatprep.subr.bf16.mxu1 %v1961_v1 }
 0x113   :  { %1364 = vmatpush3.bf16.msra.mxu0 %v1563_v16 }
 0x114   :  { %1389 = vmatprep.subr.bf16.mxu0 %v1961_v1  ;;  %1384 = vmatpush3.bf16.msra.mxu1 %v1571_v22  ;;  %v1595_v22 = vld [vmem:[#allocation17 + $0x30] sm:$0xff]  }
 0x115   :  { %1409 = vmatprep.subr.bf16.mxu1 %v1961_v1 }
 0x17a   :  { %v227_v20 = vpop.permute.xlu0 %226 }
 0x17b   :  { %vm228_vm1 = vcmp.eq.s32.totalorder %v224_v19, %v227_v20 }
 0x17c   :  { %vm1205_vm2 = vmpackc.low %vm228_vm1, %vm228_vm1 }
 0x17d   :  { %1366 = vmatmul.mubr.msk.bf16.vlgmr.msra.gmra.mrb[0].mxu0 %vm1205_vm2, %v1963_v21 }
 0x17e   :  { %1405 = vmatprep.mubr.msk.bf16.mxu0 %vm1962_vm0, %v1961_v1  ;;  %1390 = vmatpush3.bf16.msra.mxu0 %v1572_v28 }
 0x17f   :  { %1391 = vmatprep.subr.bf16.mxu0 %v1961_v1 }
 0x182   :  { %1392 = vmatpush3.bf16.msra.mxu0 %v1573_v29 }
 0x183   :  { %1393 = vmatprep.subr.bf16.mxu0 %v1961_v1 }
 0x186   :  { %1394 = vmatpush3.bf16.msra.mxu0 %v1574_v30 }
 0x187   :  { %1395 = vmatprep.subr.bf16.mxu0 %v1961_v1 }
 0x18a   :  { %1396 = vmatpush3.bf16.msra.mxu0 %v1575_v31 }
 0x18b   :  { %1397 = vmatprep.subr.bf16.mxu0 %v1961_v1 }
 0x18e   :  { %1398 = vmatpush3.bf16.msra.mxu0 %v1576_v32  ;;  %v1239_v32 = vld [vmem:[#allocation19] ss:$0 sm:$0xff] }
 0x18f   :  { %1399 = vmatprep.subr.bf16.mxu0 %v1961_v1 }
 0x192   :  { %1400 = vmatpush3.bf16.msra.mxu0 %v1577_v33 }
 0x193   :  { %1401 = vmatprep.subr.bf16.mxu0 %v1961_v1 }
 0x196   :  { %1402 = vmatpush3.bf16.msra.mxu0 %v1578_v34 }
 0x197   :  { %1403 = vmatprep.subr.bf16.mxu0 %v1961_v1 }
 0x19a   :  { %1404 = vmatpush3.bf16.msra.mxu0 %v1579_v35 }
 0x19b   :  { %1435 = vmatprep.subr.bf16.mxu0 %v1961_v1 }
 0x250   :  { %v330_v23 = vpop.f32.mrb[0].mxu0 }
 0x251   :  { %v336_v24 = vpack.c.bf16 %v330_v23, %v330_v23  ;;  %v1367_v25 = vpop.f32.mrb[1].mxu0  ;;  %v1596_v23 = vld [vmem:[#allocation17 + $0x38] sm:$0xff]  }
 0x252   :  { %v333_v26 = vpop.f32.mrb[2].mxu0 }
 0x253   :  { %v1368_v27 = vpop.f32.mrb[3].mxu0  ;;  %1386 = vmatmul.mubr.bf16.vlgmr.msra.gmra.mrb[0].mxu1 %v336_v24  ;;  %v1230_v24 = vld [vmem:[#allocation16] ss:$0 sm:$0xff] }
 0x254   :  { %1411 = vmatprep.mubr.msk.bf16.mxu1 %vm1962_vm0, %v1961_v1  ;;  %1410 = vmatpush3.bf16.msra.mxu1 %v1580_v36 }
 0x255   :  { %1415 = vmatprep.subr.bf16.mxu1 %v1961_v1 }
 0x25b   :  { %1412 = vmatmul.mubr.msk.bf16.vlgmr.msra.gmra.mrb[4].mxu1 %vm591_vm3, %v575_v38 }
 0x25c   :  { %1431 = vmatprep.mubr.msk.bf16.mxu1 %vm1962_vm0, %v1961_v1  ;;  %1416 = vmatpush3.bf16.msra.mxu1 %v2274_v51 }
 0x25d   :  { %1417 = vmatprep.subr.bf16.mxu1 %v1961_v1 }
 0x260   :  { %1418 = vmatpush3.bf16.msra.mxu1 %v2278_v52 }
 0x261   :  { %1419 = vmatprep.subr.bf16.mxu1 %v1961_v1 }
 0x264   :  { %1420 = vmatpush3.bf16.msra.mxu1 %v2282_v53 }
 0x265   :  { %1421 = vmatprep.subr.bf16.mxu1 %v1961_v1 }
 0x268   :  { %1422 = vmatpush3.bf16.msra.mxu1 %v1584_v54 }
 0x269   :  { %1423 = vmatprep.subr.bf16.mxu1 %v1961_v1 }
 0x26c   :  { %1424 = vmatpush3.bf16.msra.mxu1 %v1585_v55 }
 0x26d   :  { %1425 = vmatprep.subr.bf16.mxu1 %v1961_v1 }
 0x270   :  { %1426 = vmatpush3.bf16.msra.mxu1 %v1586_v56 }
 0x271   :  { %1427 = vmatprep.subr.bf16.mxu1 %v1961_v1 }
 0x274   :  { %1428 = vmatpush3.bf16.msra.mxu1 %v1587_v61 }
 0x275   :  { %1429 = vmatprep.subr.bf16.mxu1 %v1961_v1 }
 0x278   :  { %1430 = vmatpush3.bf16.msra.mxu1 %v1588_v62 }
 0x279   :  { %1455 = vmatprep.subr.bf16.mxu1 %v1961_v1 }
 0x326   :  { %v442_v40 = vpop.f32.mrb[0].mxu1 }
 0x327   :  { %v443_v41 = vadd.f32 %v1207_v39, %v442_v40  ;;  %v1387_v42 = vpop.f32.mrb[1].mxu1 }
 0x328   :  { %v445_v43 = vpop.f32.mrb[2].mxu1  ;;  %v1598_v42 = vld [vmem:[#allocation20 + $0x8] sm:$0xff]  }
 0x329   :  { %v1216_v44 = vmul.f32 -1.442695, %v443_v41  ;;  %v1388_v45 = vpop.f32.mrb[3].mxu1  ;;  %v1599_v43 = vld [vmem:[#allocation20 + $0x10] sm:$0xff]  }
 0x32a   :  { %v1601_v45 = vld [vmem:[#allocation20 + $0x20] sm:$0xff]  }
 0x32b   :  { %1613 = vpow2.f32 %v1216_v44  ;;  %v1600_v44 = vld [vmem:[#allocation20 + $0x18] sm:$0xff]  }
 0x32e   :  { %v629_v57 = vpop.f32.mrb[4].mxu1 }
 0x32f   :  { %v1413_v58 = vpop.f32.mrb[5].mxu1  ;;  %v630_v16 = vadd.f32 %v1227_v15, %v629_v57  ;;  %v1606_v57 = vld [vmem:[%s2426_s15 + $0x8] sm:$0xff]  }
 0x330   :  { %v632_v59 = vpop.f32.mrb[6].mxu1  ;;  %v1607_v58 = vld [vmem:[%s2426_s15 + $0x10] sm:$0xff]  }
 0x331   :  { %v1414_v60 = vpop.f32.mrb[7].mxu1  ;;  %v2318_v17 = vmax.f32 %v630_v16, 0.0  ;;  %v1608_v59 = vld [vmem:[%s2426_s15 + $0x18] sm:$0xff]  }
 0x332   :  { %v1609_v60 = vld [vmem:[%s2426_s15 + $0x20] sm:$0xff]  }
 0x335   :  { %v1614_v46 = vpop.eup %1613 }
 0x336   :  { %v451_v47 = vadd.f32 1.0, %v1614_v46  ;;  %v1602_v46 = vld [vmem:[#allocation20 + $0x28] sm:$0xff]  }
 0x338   :  { %1615 = vrcp.f32 %v451_v47 }
 0x342   :  { %v1616_v48 = vpop.eup %1615 }
 0x343   :  { %v454_v49 = vmul.f32 %v1616_v48, %v443_v41  ;;  %v1597_v41 = vld [vmem:[#allocation20] sm:$0xff]  }
 0x345   :  { %v455_v50 = vpack.c.bf16 %v454_v49, %v454_v49 }
 0x347   :  { %1406 = vmatmul.mubr.bf16.vlgmr.msra.gmra.mrb[4].mxu0 %v455_v50 }
 0x348   :  { %1451 = vmatprep.mubr.msk.bf16.mxu0 %vm1962_vm0, %v1961_v1  ;;  %1436 = vmatpush3.bf16.msra.mxu0 %v2291_v63 }
 0x349   :  { %1437 = vmatprep.subr.bf16.mxu0 %v1961_v1 }
 0x34c   :  { %1438 = vmatpush3.bf16.msra.mxu0 %v2294_v0 }
 0x34d   :  { %1439 = vmatprep.subr.bf16.mxu0 %v1961_v1 }
 0x350   :  { %1440 = vmatpush3.bf16.msra.mxu0 %v2298_v2 }
 0x351   :  { %1441 = vmatprep.subr.bf16.mxu0 %v1961_v1 }
 0x354   :  { %1442 = vmatpush3.bf16.msra.mxu0 %v2302_v3 }
 0x355   :  { %1443 = vmatprep.subr.bf16.mxu0 %v1961_v1 }
 0x358   :  { %1444 = vmatpush3.bf16.msra.mxu0 %v2306_v4 }
 0x359   :  { %1445 = vmatprep.subr.bf16.mxu0 %v1961_v1 }
 0x35c   :  { %1446 = vmatpush3.bf16.msra.mxu0 %v2310_v5 }
 0x35d   :  { %1447 = vmatprep.subr.bf16.mxu0 %v1961_v1 }
 0x360   :  { %1448 = vmatpush3.bf16.msra.mxu0 %v1595_v22 }
 0x361   :  { %1449 = vmatprep.subr.bf16.mxu0 %v1961_v1 }
 0x364   :  { %1450 = vmatpush3.bf16.msra.mxu0 %v1596_v23 }
 0x365   :  { %1475 = vmatprep.subr.bf16.mxu0 %v1961_v1 }
 0x41a   :  { %v561_v7 = vpop.f32.mrb[4].mxu0 }
 0x41b   :  { %v562_v8 = vadd.f32 %v1217_v6, %v561_v7  ;;  %v1407_v9 = vpop.f32.mrb[5].mxu0  ;;  %v1611_v7 = vld [vmem:[%s2426_s15 + $0x30] sm:$0xff]  }
 0x41c   :  { %v564_v10 = vpop.f32.mrb[6].mxu0  ;;  %v1248_v9 = vld [vmem:[#allocation22] ss:$0 sm:$0xff] }
 0x41d   :  { %v1226_v11 = vmul.f32 -1.442695, %v562_v8  ;;  %v1408_v12 = vpop.f32.mrb[7].mxu0 }
 0x41f   :  { %1617 = vpow2.f32 %v1226_v11 }
 0x429   :  { %v1618_v13 = vpop.eup %1617 }
 0x42a   :  { %v570_v14 = vadd.f32 1.0, %v1618_v13 }
 0x42c   :  { %1619 = vrcp.f32 %v570_v14 }
 0x436   :  { %v1620_v18 = vpop.eup %1619 }
 0x437   :  { %v573_v19 = vmul.f32 %v1620_v18, %v562_v8  ;;  %v1612_v8 = vld [vmem:[%s2426_s15 + $0x38] sm:$0xff]  }
 0x439   :  { %v636_v20 = vadd.f32 %v2318_v17, %v573_v19 }
 0x43b   :  { %v637_v21 = vpack.c.bf16 %v636_v20, %v636_v20 }
 0x43d   :  { %1432 = vmatmul.mubr.bf16.vlgmr.msra.gmra.mrb[8].mxu1 %v637_v21 }
 0x43e   :  { %1456 = vmatpush3.bf16.msra.mxu1 %v2274_v51  ;;  %1471 = vmatprep.mubr.msk.bf16.mxu1 %vm1962_vm0, %v1961_v1 }
 0x43f   :  { %1457 = vmatprep.subr.bf16.mxu1 %v1961_v1 }
 0x442   :  { %1458 = vmatpush3.bf16.msra.mxu1 %v2278_v52 }
 0x443   :  { %1459 = vmatprep.subr.bf16.mxu1 %v1961_v1 }
 0x446   :  { %1460 = vmatpush3.bf16.msra.mxu1 %v2282_v53 }
 0x447   :  { %1461 = vmatprep.subr.bf16.mxu1 %v1961_v1 }
 0x44a   :  { %1462 = vmatpush3.bf16.msra.mxu1 %v1584_v54  ;;  %v1603_v54 = vld [vmem:[#allocation20 + $0x30] sm:$0xff]  }
 0x44b   :  { %1463 = vmatprep.subr.bf16.mxu1 %v1961_v1 }
 0x44e   :  { %1464 = vmatpush3.bf16.msra.mxu1 %v1585_v55  ;;  %v1604_v55 = vld [vmem:[#allocation20 + $0x38] sm:$0xff]  }
 0x44f   :  { %1465 = vmatprep.subr.bf16.mxu1 %v1961_v1 }
 0x452   :  { %1466 = vmatpush3.bf16.msra.mxu1 %v1586_v56  ;;  %v1605_v56 = vld [vmem:[%s2426_s15] sm:$0xff]  }
 0x453   :  { %1467 = vmatprep.subr.bf16.mxu1 %v1961_v1 }
 0x456   :  { %1468 = vmatpush3.bf16.msra.mxu1 %v1587_v61  ;;  %v1610_v61 = vld [vmem:[%s2426_s15 + $0x28] sm:$0xff]   ;;  %s1907_s15 = scalar_lea.vmem %s1182_s18, 128 }
 0x457   :  { %1469 = vmatprep.subr.bf16.mxu1 %v1961_v1  ;;  %p1908_p6 = scmp.ne.s32.totalorder %s1182_s18, %s1907_s15  ;;  %p1913_p8 = scmp.lt.s32.totalorder %s1907_s15, %s1907_s15 }
 0x459   :  { %p1914_p9 = por %p1913_p8, %p1912_p7 }
 0x45a   :  { %1470 = vmatpush3.bf16.msra.mxu1 %v1588_v62 }
 0x45b   :  { %1495 = vmatprep.subr.bf16.mxu1 %v1961_v1  ;;  %p1915_p10 = pnand %p1914_p9, %p1908_p6 }
 0x510   :  { %v743_v25 = vpop.f32.mrb[8].mxu1 }
 0x511   :  { %v744_v26 = vadd.f32 %v1230_v24, %v743_v25  ;;  %v1433_v27 = vpop.f32.mrb[9].mxu1 }
 0x512   :  { %v746_v28 = vpop.f32.mrb[10].mxu1 }
 0x513   :  { %v749_v29 = vmax.f32 %v744_v26, 0.0  ;;  %v1434_v30 = vpop.f32.mrb[11].mxu1 }
 0x515   :  { %v750_v31 = vpack.c.bf16 %v749_v29, %v749_v29 }
 0x517   :  { %1452 = vmatmul.mubr.bf16.vlgmr.msra.gmra.mrb[8].mxu0 %v750_v31 }
 0x518   :  { %1476 = vmatpush3.bf16.msra.mxu0 %v2291_v63  ;;  %1491 = vmatprep.mubr.msk.bf16.mxu0 %vm1962_vm0, %v1961_v1 }
 0x519   :  { %1477 = vmatprep.subr.bf16.mxu0 %v1961_v1 }
 0x51c   :  { %1478 = vmatpush3.bf16.msra.mxu0 %v2294_v0 }
 0x51d   :  { %1479 = vmatprep.subr.bf16.mxu0 %v1961_v1 }
 0x520   :  { %1480 = vmatpush3.bf16.msra.mxu0 %v2298_v2 }
 0x521   :  { %1481 = vmatprep.subr.bf16.mxu0 %v1961_v1 }
 0x524   :  { %1482 = vmatpush3.bf16.msra.mxu0 %v2302_v3 }
 0x525   :  { %1483 = vmatprep.subr.bf16.mxu0 %v1961_v1 }
 0x528   :  { %1484 = vmatpush3.bf16.msra.mxu0 %v2306_v4 }
 0x529   :  { %1485 = vmatprep.subr.bf16.mxu0 %v1961_v1 }
 0x52c   :  { %1486 = vmatpush3.bf16.msra.mxu0 %v2310_v5 }
 0x52d   :  { %1487 = vmatprep.subr.bf16.mxu0 %v1961_v1 }
 0x530   :  { %1488 = vmatpush3.bf16.msra.mxu0 %v1595_v22 }
 0x531   :  { %1489 = vmatprep.subr.bf16.mxu0 %v1961_v1 }
 0x534   :  { %1490 = vmatpush3.bf16.msra.mxu0 %v1596_v23 }
 0x535   :  { %1515 = vmatprep.subr.bf16.mxu0 %v1961_v1 }
 0x5ea   :  { %v856_v33 = vpop.f32.mrb[8].mxu0 }
 0x5eb   :  { %v857_v34 = vadd.f32 %v1239_v32, %v856_v33  ;;  %v1453_v35 = vpop.f32.mrb[9].mxu0 }
 0x5ec   :  { %v859_v36 = vpop.f32.mrb[10].mxu0 }
 0x5ed   :  { %v862_v37 = vadd.f32 %v857_v34, %v2318_v17  ;;  %v1454_v38 = vpop.f32.mrb[11].mxu0 }
 0x5ef   :  { %v863_v39 = vadd.f32 %v862_v37, %v573_v19 }
 0x5f1   :  { %v864_v40 = vpack.c.bf16 %v863_v39, %v863_v39 }
 0x5f3   :  { %1472 = vmatmul.mubr.bf16.vlgmr.msra.gmra.mrb[12].mxu1 %v864_v40 }
 0x5f4   :  { %1511 = vmatprep.mubr.msk.bf16.mxu1 %vm1962_vm0, %v1961_v1  ;;  %1496 = vmatpush3.bf16.msra.mxu1 %v1597_v41 }
 0x5f5   :  { %1497 = vmatprep.subr.bf16.mxu1 %v1961_v1 }
 0x5f8   :  { %1498 = vmatpush3.bf16.msra.mxu1 %v1598_v42 }
 0x5f9   :  { %1499 = vmatprep.subr.bf16.mxu1 %v1961_v1 }
 0x5fc   :  { %1500 = vmatpush3.bf16.msra.mxu1 %v1599_v43 }
 0x5fd   :  { %1501 = vmatprep.subr.bf16.mxu1 %v1961_v1 }
 0x600   :  { %1502 = vmatpush3.bf16.msra.mxu1 %v1600_v44 }
 0x601   :  { %1503 = vmatprep.subr.bf16.mxu1 %v1961_v1 }
 0x604   :  { %1504 = vmatpush3.bf16.msra.mxu1 %v1601_v45 }
 0x605   :  { %1505 = vmatprep.subr.bf16.mxu1 %v1961_v1 }
 0x608   :  { %1506 = vmatpush3.bf16.msra.mxu1 %v1602_v46 }
 0x609   :  { %1507 = vmatprep.subr.bf16.mxu1 %v1961_v1 }
 0x60c   :  { %1508 = vmatpush3.bf16.msra.mxu1 %v1603_v54 }
 0x60d   :  { %1509 = vmatprep.subr.bf16.mxu1 %v1961_v1 }
 0x610   :  { %1510 = vmatpush3.bf16.msra.mxu1 %v1604_v55 }
 0x6c6   :  { %v899_v47 = vpop.f32.mrb[12].mxu1 }
 0x6c7   :  { %v900_v48 = vadd.f32 %v1230_v24, %v899_v47  ;;  %v1473_v49 = vpop.f32.mrb[13].mxu1 }
 0x6c8   :  { %v902_v50 = vpop.f32.mrb[14].mxu1 }
 0x6c9   :  { %v905_v51 = vmax.f32 %v900_v48, 0.0  ;;  %v1474_v52 = vpop.f32.mrb[15].mxu1 }
 0x6cb   :  { %v906_v53 = vpack.c.bf16 %v905_v51, %v905_v51 }
 0x6cd   :  { %1492 = vmatmul.mubr.bf16.vlgmr.msra.gmra.mrb[12].mxu0 %v906_v53 }
 0x6ce   :  { %1531 = vmatprep.mubr.msk.bf16.mxu0 %vm1962_vm0, %v1961_v1  ;;  %1516 = vmatpush3.bf16.msra.mxu0 %v1605_v56 }
 0x6cf   :  { %1517 = vmatprep.subr.bf16.mxu0 %v1961_v1 }
 0x6d2   :  { %1518 = vmatpush3.bf16.msra.mxu0 %v1606_v57 }
 0x6d3   :  { %1519 = vmatprep.subr.bf16.mxu0 %v1961_v1 }
 0x6d6   :  { %1520 = vmatpush3.bf16.msra.mxu0 %v1607_v58 }
 0x6d7   :  { %1521 = vmatprep.subr.bf16.mxu0 %v1961_v1 }
 0x6da   :  { %1522 = vmatpush3.bf16.msra.mxu0 %v1608_v59 }
 0x6db   :  { %1523 = vmatprep.subr.bf16.mxu0 %v1961_v1 }
 0x6de   :  { %1524 = vmatpush3.bf16.msra.mxu0 %v1609_v60 }
 0x6df   :  { %1525 = vmatprep.subr.bf16.mxu0 %v1961_v1 }
 0x6e2   :  { %1526 = vmatpush3.bf16.msra.mxu0 %v1610_v61 }
 0x6e3   :  { %1527 = vmatprep.subr.bf16.mxu0 %v1961_v1 }
 0x6e6   :  { %1528 = vmatpush3.bf16.msra.mxu0 %v1611_v7 }
 0x6e7   :  { %1529 = vmatprep.subr.bf16.mxu0 %v1961_v1 }
 0x6ea   :  { %1530 = vmatpush3.bf16.msra.mxu0 %v1612_v8 }
 0x7a0   :  { %v941_v62 = vpop.f32.mrb[12].mxu0 }
 0x7a1   :  { %v942_v63 = vadd.f32 %v1239_v32, %v941_v62  ;;  %v1493_v0 = vpop.f32.mrb[13].mxu0 }
 0x7a2   :  { %v944_v2 = vpop.f32.mrb[14].mxu0 }
 0x7a3   :  { %v947_v3 = vadd.f32 %v942_v63, %v862_v37  ;;  %v1494_v4 = vpop.f32.mrb[15].mxu0 }
 0x7a5   :  { %v948_v5 = vsub.f32 %v947_v3, %v2318_v17  ;;  %v1257_v17 = vld [vmem:[%s2427_s16] ss:$0 sm:$0xff] }
 0x7a7   :  { %v949_v6 = vpack.c.bf16 %v948_v5, %v948_v5 }
 0x7a9   :  { %1512 = vmatmul.mubr.bf16.vlgmr.msra.gmra.mrb[16].mxu1 %v949_v6 }
 0x87c   :  { %v1055_v10 = vpop.f32.mrb[16].mxu1 }
 0x87d   :  { %v1056_v11 = vadd.f32 %v1248_v9, %v1055_v10  ;;  %v1513_v12 = vpop.f32.mrb[17].mxu1 }
 0x87e   :  { %v1058_v13 = vpop.f32.mrb[18].mxu1 }
 0x87f   :  { %v1061_v14 = vmax.f32 %v1056_v11, 0.0  ;;  %v1514_v15 = vpop.f32.mrb[19].mxu1 }
 0x881   :  { %v1062_v16 = vpack.c.bf16 %v1061_v14, %v1061_v14 }
 0x883   :  { %1532 = vmatmul.mubr.bf16.vlgmr.msra.gmra.mrb[16].mxu0 %v1062_v16 }
 0x956   :  { %v1168_v1 = vpop.f32.mrb[16].mxu0 }
 0x957   :  { %v1169_v18 = vadd.f32 %v1257_v17, %v1168_v1  ;;  %v1533_v19 = vpop.f32.mrb[17].mxu0 }
 0x958   :  { %v1171_v20 = vpop.f32.mrb[18].mxu0 }
 0x959   :  { %1174 = vst [vmem:[#allocation23] sm:$0xff] %v1169_v18  ;;  %v1534_v21 = vpop.f32.mrb[19].mxu0 }
 0x95a   :  { %1918 = shalt.err (!%p1915_p10)
}
 0x95b   :  { %s2436_s12 = sld [smem:[#allocation34_spill]] }
 0x961   :  { %s1919_s16 = scalar_lea.hbm %s2436_s12, 128 }
 0x962   :  { %p1920_p11 = scmp.ne.s32.totalorder %s2436_s12, %s1919_s16  ;;  %p1923_p12 = scmp.lt.u32.totalorder %s1919_s16, %s2436_s12 }
 0x964   :  { %p1925_p13 = pnand %p1923_p12, %p1920_p11 }
 0x966   :  { %1928 = shalt.err (!%p1925_p13)
}
 0x967   :  { %1184 = dma.vmem_to_hbm [thread:$0]  %s1182_s18, 128, %s2436_s12, [#allocation4]  }
 0x968   :  { %1943 = dma.done.wait [#allocation4], 128  }
 0x969   :  { %1944 = vsyncadd [#allocation4], 4294967168 }
 0x96a   :  { %1188 = vsyncpa [#allocation3], 1 }
 0x96b   :  { %1189 = vsyncpa [#allocation6], 1 }
 0x96c   :  { %1190 = vsyncpa [#allocation9], 1 }
 0x96d   :  { %1191 = vsyncpa [#allocation12], 1 }
 0x96e   :  { %1192 = vsyncpa [#allocation15], 1 }
 0x96f   :  { %1193 = vsyncpa [#allocation18], 1 }
 0x970   :  { %1194 = vsyncpa [#allocation21], 1 }
 0x971   :  { %1195 = vsyncpa [#allocation4], 1 }

</bundles_post_ra>
